<compile_context>
chip_gen: v7x
topology: tpu7x:2x2x1
jax: 0.10.0
libtpu: 0.0.40
codegen_flags: <defaults>
</compile_context>

<pallas_src>
import functools

import jax
import jax.numpy as jnp
from jax.experimental import pallas as pl
from jax.experimental.pallas import tpu as pltpu

_LANES = 1024                        # lane-dense slab width (8 vregs, multiple of 128)
_MAX_BLOCK_BYTES = 2 * 1024 * 1024   # per-block cap; double-buffered fits all gens


def _gaussian_noise_kernel_tpu(seed_ref, x_ref, o_ref, *, sigma):
    """Fast path: noise generated in-kernel with the TPU hardware PRNG."""
    # Tile id as a separate seed word -> independent, collision-free streams.
    pltpu.prng_seed(seed_ref[0], pl.program_id(0))
    noise = jnp.float32(sigma) * pltpu.stateful_normal(x_ref.shape, jnp.float32)
    # Add in f32, single cast to the output dtype.
    o_ref[...] = (x_ref[...].astype(jnp.float32) + noise).astype(o_ref.dtype)


def _add_kernel(x_ref, n_ref, o_ref):
    """Portable fallback: elementwise add of precomputed noise."""
    o_ref[...] = (x_ref[...].astype(jnp.float32) + n_ref[...]).astype(o_ref.dtype)


def _choose_row_tile(rows, itemsize):
    """Row (sublane) tile: <= _MAX_BLOCK_BYTES per block, multiple of 8, and
    split so the grid has >= 2 steps whenever rows allow (v7x megacore)."""
    cap = max(8, (_MAX_BLOCK_BYTES // (_LANES * itemsize)) // 8 * 8)
    tb = min(cap, rows)
    if rows > 8 and pl.cdiv(rows, tb) < 2:
        tb = max(8, ((pl.cdiv(rows, 2) + 7) // 8) * 8)
    return tb


def _gaussian_noise_tpu(x2, seed_arr, sigma):
    rows, lanes = x2.shape
    tb = _choose_row_tile(rows, x2.dtype.itemsize)
    grid = (pl.cdiv(rows, tb),)
    kernel = functools.partial(_gaussian_noise_kernel_tpu, sigma=float(sigma))
    return pl.pallas_call(
        kernel,
        out_shape=jax.ShapeDtypeStruct((rows, lanes), x2.dtype),
        grid_spec=pltpu.PrefetchScalarGridSpec(
            num_scalar_prefetch=1,  # seed lands in SMEM before the grid runs
            grid=grid,
            in_specs=[pl.BlockSpec((tb, lanes), lambda i, seed_ref: (i, 0))],
            out_specs=pl.BlockSpec((tb, lanes), lambda i, seed_ref: (i, 0)),
        ),
        compiler_params=pltpu.CompilerParams(
            dimension_semantics=("parallel",),
        ),
    )(seed_arr, x2)


def _gaussian_noise_fallback(x2, seed, sigma):
    # TODO(synk): different RNG stream than np.random / the TPU hardware PRNG.
    noise = jnp.float32(sigma) * jax.random.normal(
        jax.random.PRNGKey(int(seed)), x2.shape, dtype=jnp.float32)
    rows, lanes = x2.shape
    tb = _choose_row_tile(rows, x2.dtype.itemsize)
    grid = (pl.cdiv(rows, tb),)
    return pl.pallas_call(
        _add_kernel,
        out_shape=jax.ShapeDtypeStruct((rows, lanes), x2.dtype),
        grid=grid,
        in_specs=[pl.BlockSpec((tb, lanes), lambda i: (i, 0)),
                  pl.BlockSpec((tb, lanes), lambda i: (i, 0))],
        out_specs=pl.BlockSpec((tb, lanes), lambda i: (i, 0)),
    )(x2, noise)


def gaussian_noise_forward(x: jax.Array, seed: int = 0, sigma: float = 0.05) -> jax.Array:
    """General-shape wrapper: flatten + pad to a lane-dense (rows, 1024) slab,
    add Gaussian noise elementwise, then restore the original shape."""
    orig_shape = x.shape
    n = x.size
    rows = max(8, ((pl.cdiv(n, _LANES) + 7) // 8) * 8)  # sublane-aligned rows
    padded = rows * _LANES

    flat = jnp.ravel(x)
    if padded != n:
        flat = jnp.pad(flat, (0, padded - n))
    x2 = flat.reshape(rows, _LANES)

    if jax.default_backend() == "tpu":
        try:
            out2 = _gaussian_noise_tpu(x2, jnp.array([seed], jnp.int32), sigma)
        except Exception:
            # Defensive: environments that force interpret mode have no
            # lowering for the TPU hardware-PRNG primitives.
            out2 = _gaussian_noise_fallback(x2, seed, sigma)
    else:
        out2 = _gaussian_noise_fallback(x2, seed, sigma)

    return out2.reshape(-1)[:n].reshape(orig_shape)


if __name__ == "__main__":
    key = jax.random.PRNGKey(0)
    sigma = 0.05
    # Small image-like augmentation input: (batch=2, channels=4, 16, 16).
    x = jax.random.normal(key, (2, 4, 16, 16), dtype=jnp.float32)

    out = gaussian_noise_forward(x, seed=12345, sigma=sigma)
    out = jax.block_until_ready(out)

    # Checks: shape, finiteness, loose statistics of the added noise.
    assert out.shape == x.shape
    noise = (out - x).astype(jnp.float32)
    assert bool(jnp.all(jnp.isfinite(noise)))
    assert abs(float(jnp.mean(noise))) < 0.02           # ~N(0, sigma/sqrt(2048))
    assert abs(float(jnp.std(noise)) - sigma) < 0.02    # sample std near sigma

    print("KERNEL_OK")
</pallas_src>

<mosaic_0001>
module attributes {stable_mosaic.version = 11 : i64} {
  func.func @_add_kernel(%arg0: i32, %arg1: memref<8x1024xf32, #tpu.memory_space<vmem>>, %arg2: memref<8x1024xf32, #tpu.memory_space<vmem>>, %arg3: memref<8x1024xf32, #tpu.memory_space<vmem>>) attributes {dimension_semantics = [#tpu.dimension_semantics<arbitrary>], iteration_bounds = array<i64: 1>, scalar_prefetch = 0 : i64, scratch_operands = 0 : i64, tpu.core_type = #tpu.core_type<tc>, window_params = [{transform_indices = @transform_0, window_bounds = array<i64: 8, 1024>}, {transform_indices = @transform_1, window_bounds = array<i64: 8, 1024>}, {transform_indices = @transform_2, window_bounds = array<i64: 8, 1024>}]} {
    %c0 = arith.constant 0 : index
    %c0_0 = arith.constant 0 : index
    %0 = vector.load %arg1[%c0, %c0_0] : memref<8x1024xf32, #tpu.memory_space<vmem>>, vector<8x1024xf32>
    %c0_1 = arith.constant 0 : index
    %c0_2 = arith.constant 0 : index
    %1 = vector.load %arg2[%c0_1, %c0_2] : memref<8x1024xf32, #tpu.memory_space<vmem>>, vector<8x1024xf32>
    %2 = arith.addf %0, %1 : vector<8x1024xf32>
    %c0_3 = arith.constant 0 : index
    %c0_4 = arith.constant 0 : index
    %3 = vector.load %arg3[%c0_3, %c0_4] : memref<8x1024xf32, #tpu.memory_space<vmem>>, vector<8x1024xf32>
    tpu.vector_store %arg3[%c0_3, %c0_4], %2 {strides = array<i32>} : memref<8x1024xf32, #tpu.memory_space<vmem>>, vector<8x1024xf32>,
    return
  }
  func.func @transform_0(%arg0: i32) -> (i32, i32) {
    %c0_i32 = arith.constant 0 : i32
    %c0_i32_0 = arith.constant 0 : i32
    return %arg0, %c0_i32 : i32, i32
  }
  func.func @transform_1(%arg0: i32) -> (i32, i32) {
    %c0_i32 = arith.constant 0 : i32
    %c0_i32_0 = arith.constant 0 : i32
    return %arg0, %c0_i32 : i32, i32
  }
  func.func @transform_2(%arg0: i32) -> (i32, i32) {
    %c0_i32 = arith.constant 0 : i32
    %c0_i32_0 = arith.constant 0 : i32
    return %arg0, %c0_i32 : i32, i32
  }
}

</mosaic_0001>

<bundles_post_ra>
// kernel: tpu_custom_call.1
= control target key start
LH: loop header
LB: loop body
LE: loop exit
PB: predicated region body
PF: predicated region fallthrough
CT: control target
= control target key end

     0   :  { %7 = vsyncpa [#allocation3], 0  ;;  %s213_s0 = inlined_call_operand.hbm [shape: f32[8,1024], index: 0, kind: input, shape index: {}]   ;;  %s214_s1 = inlined_call_operand.hbm [shape: f32[8,1024], index: 1, kind: input, shape index: {}]   ;;  %s215_s2 = inlined_call_operand.hbm [shape: f32[8,1024], index: 2, kind: output, shape index: {}]  }
   0x1   :  { %8 = vsyncpa [#allocation6], 0 }
   0x2   :  { %9 = vsyncpa [#allocation4], 0  ;;  %s159_s9 = smov [#allocation2]   ;;  %s160_s11 = smov [#allocation5]  }
   0x3   :  { %s16_s10 = sshll.u32 %s159_s9, 4  ;;  %s26_s12 = sshll.u32 %s160_s11, 4  ;;  %s17_s10 = int_to_ptr.vmem [resolvable:$true] %s16_s10  ;;  %s27_s12 = int_to_ptr.vmem [resolvable:$true] %s26_s12 }
   0x4   :  { %s87_s15 = scalar_lea.hbm %s213_s0, 1024 }
   0x5   :  { %p88_p0 = scmp.ne.s32.totalorder %s213_s0, %s87_s15  ;;  %p91_p1 = scmp.lt.u32.totalorder %s87_s15, %s213_s0 }
   0x7   :  { %p93_p2 = pnand %p91_p1, %p88_p0 }
   0x9   :  { %96 = shalt.err (!%p93_p2)
}
   0xa   :  { %s97_s20 = scalar_lea.vmem %s17_s10, 1024  ;;  %p102_p4 = scmp.lt.s32.totalorder %s17_s10, %s17_s10 }
   0xb   :  { %p98_p3 = scmp.ne.s32.totalorder %s17_s10, %s97_s20  ;;  %p103_p5 = scmp.lt.s32.totalorder %s97_s20, %s97_s20 }
   0xd   :  { %p104_p6 = por %p103_p5, %p102_p4 }
   0xf   :  { %p105_p7 = pnand %p104_p6, %p98_p3 }
  0x11   :  { %108 = shalt.err (!%p105_p7)
}
  0x12   :  { %19 = dma.hbm_to_vmem [thread:$0]  %s213_s0, 1024, %s17_s10, [#allocation3]  }
  0x13   :  { %s109_s25 = scalar_lea.hbm %s214_s1, 1024 }
  0x14   :  { %p110_p8 = scmp.ne.s32.totalorder %s214_s1, %s109_s25  ;;  %p113_p9 = scmp.lt.u32.totalorder %s109_s25, %s214_s1 }
  0x16   :  { %p115_p10 = pnand %p113_p9, %p110_p8 }
  0x18   :  { %118 = shalt.err (!%p115_p10)
}
  0x19   :  { %s119_s30 = scalar_lea.vmem %s27_s12, 1024  ;;  %p124_p12 = scmp.lt.s32.totalorder %s27_s12, %s27_s12 }
  0x1a   :  { %p120_p11 = scmp.ne.s32.totalorder %s27_s12, %s119_s30  ;;  %p125_p13 = scmp.lt.s32.totalorder %s119_s30, %s119_s30 }
  0x1c   :  { %p126_p0 = por %p125_p13, %p124_p12 }
  0x1e   :  { %p127_p1 = pnand %p126_p0, %p120_p11 }
  0x20   :  { %130 = shalt.err (!%p127_p1)
}
  0x21   :  { %29 = dma.hbm_to_vmem [thread:$0]  %s214_s1, 1024, %s27_s12, [#allocation6]  }
  0x22   :  { %153 = dma.done.wait [#allocation3], 1024  }
  0x23   :  { %154 = vsyncadd [#allocation3], 4294966272 }
  0x24   :  { %155 = dma.done.wait [#allocation6], 1024  }
  0x25   :  { %156 = vsyncadd [#allocation6], 4294966272  ;;  %v36_v0 = vld [vmem:[#allocation2] sm:$0xff]  ;;  %v37_v2 = vld [vmem:[#allocation2 + $0x8] sm:$0xff]  ;;  %s161_s1 = smov [#allocation7]  }
  0x26   :  { %v44_v1 = vld [vmem:[#allocation5] sm:$0xff]  ;;  %v45_v4 = vld [vmem:[#allocation5 + $0x8] sm:$0xff]  ;;  %v38_v5 = vld [vmem:[#allocation2 + $0x10] sm:$0xff]  ;;  %s74_s4 = sshll.u32 %s161_s1, 4  ;;  %s75_s4 = int_to_ptr.vmem [resolvable:$true] %s74_s4 }
  0x27   :  { %v52_v3 = vadd.f32 %v44_v1, %v36_v0  ;;  %v46_v6 = vld [vmem:[#allocation5 + $0x10] sm:$0xff]  ;;  %v53_v7 = vadd.f32 %v45_v4, %v37_v2  ;;  %v39_v9 = vld [vmem:[#allocation2 + $0x18] sm:$0xff]  ;;  %v40_v11 = vld [vmem:[#allocation2 + $0x20] sm:$0xff]  ;;  %s131_s5 = scalar_lea.vmem %s75_s4, 1024  ;;  %p136_p3 = scmp.lt.s32.totalorder %s75_s4, %s75_s4 }
  0x28   :  { %v54_v8 = vadd.f32 %v46_v6, %v38_v5  ;;  %v47_v10 = vld [vmem:[#allocation5 + $0x18] sm:$0xff]  ;;  %v48_v13 = vld [vmem:[#allocation5 + $0x20] sm:$0xff]  ;;  %v41_v14 = vld [vmem:[#allocation2 + $0x28] sm:$0xff]  ;;  %p132_p2 = scmp.ne.s32.totalorder %s75_s4, %s131_s5  ;;  %p137_p4 = scmp.lt.s32.totalorder %s131_s5, %s131_s5 }
  0x29   :  { %60 = vst [vmem:[#allocation7] sm:$0xff] %v52_v3  ;;  %v55_v12 = vadd.f32 %v47_v10, %v39_v9  ;;  %v49_v15 = vld [vmem:[#allocation5 + $0x28] sm:$0xff]  ;;  %61 = vst [vmem:[#allocation7 + $0x8] sm:$0xff] %v53_v7  ;;  %v56_v16 = vadd.f32 %v48_v13, %v40_v11  ;;  %v42_v18 = vld [vmem:[#allocation2 + $0x30] sm:$0xff] }
  0x2a   :  { %62 = vst [vmem:[#allocation7 + $0x10] sm:$0xff] %v54_v8  ;;  %v57_v17 = vadd.f32 %v49_v15, %v41_v14  ;;  %v50_v19 = vld [vmem:[#allocation5 + $0x30] sm:$0xff]  ;;  %v43_v20 = vld [vmem:[#allocation2 + $0x38] sm:$0xff]  ;;  %p138_p5 = por %p137_p4, %p136_p3 }
  0x2b   :  { %63 = vst [vmem:[#allocation7 + $0x18] sm:$0xff] %v55_v12  ;;  %v58_v21 = vadd.f32 %v50_v19, %v42_v18  ;;  %v51_v22 = vld [vmem:[#allocation5 + $0x38] sm:$0xff]  ;;  %64 = vst [vmem:[#allocation7 + $0x20] sm:$0xff] %v56_v16 }
  0x2c   :  { %65 = vst [vmem:[#allocation7 + $0x28] sm:$0xff] %v57_v17  ;;  %v59_v23 = vadd.f32 %v51_v22, %v43_v20  ;;  %p139_p6 = pnand %p138_p5, %p132_p2 }
  0x2d   :  { %66 = vst [vmem:[#allocation7 + $0x30] sm:$0xff] %v58_v21 }
  0x2e   :  { %67 = vst [vmem:[#allocation7 + $0x38] sm:$0xff] %v59_v23 }
  0x2f   :  { %142 = shalt.err (!%p139_p6)
}
  0x30   :  { %s143_s8 = scalar_lea.hbm %s215_s2, 1024 }
  0x31   :  { %p144_p7 = scmp.ne.s32.totalorder %s215_s2, %s143_s8  ;;  %p147_p8 = scmp.lt.u32.totalorder %s143_s8, %s215_s2 }
  0x33   :  { %p149_p9 = pnand %p147_p8, %p144_p7 }
  0x35   :  { %152 = shalt.err (!%p149_p9)
}
  0x36   :  { %77 = dma.vmem_to_hbm [thread:$0]  %s75_s4, 1024, %s215_s2, [#allocation4]  }
  0x37   :  { %157 = dma.done.wait [#allocation4], 1024  }
  0x38   :  { %158 = vsyncadd [#allocation4], 4294966272 }
  0x39   :  { %81 = vsyncpa [#allocation3], 1 }
  0x3a   :  { %82 = vsyncpa [#allocation6], 1 }
  0x3b   :  { %83 = vsyncpa [#allocation4], 1 }

</bundles_post_ra>
